<compile_context>
chip_gen: v5e
topology: v5e:2x2
jax: 0.10.0
libtpu: 0.0.40
codegen_flags: <defaults>
</compile_context>

<pallas_src>
import jax
import jax.numpy as jnp
from jax import lax
from jax.experimental import pallas as pl
from jax.experimental.pallas import tpu as pltpu


def _device_tuning():
    """(target_block_bytes, vmem_limit_bytes, multi_tensorcore) per generation."""
    try:
        kind = jax.devices()[0].device_kind.lower()
    except Exception:  # pragma: no cover - non-TPU fallback
        kind = ""
    if "v7" in kind:
        return 4 << 20, 32 << 20, True    # 64 MiB physical VMEM, 2 TCs
    if "v6" in kind:
        return 4 << 20, 64 << 20, False   # 128 MiB physical VMEM
    if "v5" in kind:
        return 2 << 20, 32 << 20, False   # keep blocks modest on v5e
    return 2 << 20, 32 << 20, False


def _choose_rows_per_block(n_rows, row_bytes, itemsize, target_bytes, multi_tc):
    """Rows per grid block: ~target bytes, aligned to the dtype sublane tile.

    No exact-divisor requirement -- the grid uses cdiv and Pallas pads/clips
    the ragged last block (pure per-row copy, so padded rows are harmless).
    """
    sub = max(8, 32 // max(itemsize, 1))          # f32->8, bf16->16, int8->32
    c = max(1, target_bytes // max(row_bytes, 1))
    if multi_tc:
        # Give both TensorCores work, but never shrink blocks below ~1 MiB.
        half = -(-n_rows // 2)
        if half * row_bytes >= (1 << 20):
            c = min(c, half)
    c = min(c, n_rows)
    if c < n_rows:
        c = max(sub, (c // sub) * sub)            # sublane-tile aligned
        c = min(c, n_rows)
    return c


def _choose_row_chunk(c_blk, row_bytes, target_bytes=64 << 10):
    """In-kernel row chunk (~64 KiB working set); no artificial >=8 floor."""
    rc = max(1, target_bytes // max(row_bytes, 1))
    if rc >= 8:
        rc = (rc // 8) * 8                        # keep sublane-aligned chunks
    return min(c_blk, rc)


def _make_kernel(x_len, y_ft, rad, c_blk, row_chunk):
    flat = x_len * y_ft
    num_full = c_blk // row_chunk
    rem = c_blk - num_full * row_chunk
    unroll = True if num_full <= 8 else 2

    def fixups_for(p):
        # (dest_row, src_row) pairs for reflected boundary rows.
        if p == 0:
            return []
        if p > 0:
            return [(t, p - t) for t in range(p)]
        q = -p
        return [(x_len - q + j, x_len - 2 - j) for j in range(q)]

    def kernel(phase_ref, x_ref, o_ref):
        # phase_ref: SMEM int32[1] (scalar prefetch), identical for all steps.
        # x_ref / o_ref: VMEM blocks of shape (c_blk, x_len*y_ft), lane-dense.
        phase = phase_ref[0]
        for p in range(-rad, rad + 1):
            @pl.when(phase == p)
            def _(p=p):
                shift = (p * y_ft) % flat
                fixes = fixups_for(p)

                def do_chunk(rows):
                    xv = x_ref[rows, :]
                    if shift == 0:
                        o_ref[rows, :] = xv
                    else:
                        # Bulk shift: one XLU lane roll; wrapped lanes are
                        # exactly the boundary rows, overwritten below.
                        o_ref[rows, :] = pltpu.roll(xv, shift, axis=xv.ndim - 1)
                    for t, s in fixes:
                        # Narrow static lane-slice copy (<= rad per chunk).
                        o_ref[rows, t * y_ft:(t + 1) * y_ft] = (
                            x_ref[rows, s * y_ft:(s + 1) * y_ft])

                if num_full == 1 and rem == 0:
                    do_chunk(slice(None))
                else:
                    def body(c, carry):
                        r0 = c * row_chunk
                        if row_chunk % 8 == 0:
                            r0 = pl.multiple_of(r0, row_chunk)
                        do_chunk(pl.ds(r0, row_chunk))
                        return carry
                    lax.fori_loop(0, num_full, body, 0, unroll=unroll)
                    if rem:
                        do_chunk(pl.ds(num_full * row_chunk, rem))

    return kernel


def phase_shuffle_2d_with_phase(x, phase, rad=2, block_bytes=None):
    """Reflect phase shift along dim 2 for a given int32 phase array of shape (1,)."""
    b, ch, x_len, y_ft = x.shape
    if not (0 <= rad <= x_len - 1):
        raise ValueError("reflect phase shuffle needs 0 <= rad <= x_len - 1")
    n = b * ch
    flat = x_len * y_ft                            # lane-dense last axis
    itemsize = x.dtype.itemsize
    row_bytes = flat * itemsize

    target_bytes, vmem_limit, multi_tc = _device_tuning()
    if block_bytes is not None:
        target_bytes = block_bytes

    c_blk = _choose_rows_per_block(n, row_bytes, itemsize, target_bytes, multi_tc)
    num_blocks = pl.cdiv(n, c_blk)                 # ragged last block is OK
    row_chunk = _choose_row_chunk(c_blk, row_bytes)

    xr = x.reshape(n, flat)                        # contiguous reshape: free
    # Clamp so exactly one pl.when branch fires (never leave o_ref unwritten).
    phase = jnp.clip(phase.astype(jnp.int32).reshape((1,)), -rad, rad)

    out = pl.pallas_call(
        _make_kernel(x_len, y_ft, rad, c_blk, row_chunk),
        out_shape=jax.ShapeDtypeStruct((n, flat), x.dtype),
        grid_spec=pltpu.PrefetchScalarGridSpec(
            num_scalar_prefetch=1,
            grid=(num_blocks,),
            in_specs=[pl.BlockSpec((c_blk, flat), lambda i, ph: (i, 0))],
            out_specs=pl.BlockSpec((c_blk, flat), lambda i, ph: (i, 0)),
        ),
        compiler_params=pltpu.CompilerParams(
            dimension_semantics=("parallel",),
            vmem_limit_bytes=vmem_limit),
        cost_estimate=pl.CostEstimate(
            flops=0, transcendentals=0,
            bytes_accessed=2 * x.size * itemsize),
    )(phase, xr)
    return out.reshape(b, ch, x_len, y_ft)


def phase_shuffle_2d(x, key, rad=2):
    """JAX/Pallas equivalent of PhaseShuffle2d(rad, 'reflect').forward(x)."""
    # torch.randint(low=-rad, high=rad+1, size=(1,)) -> uniform in [-rad, rad]
    phase = jax.random.randint(key, (1,), -rad, rad + 1, dtype=jnp.int32)
    return phase_shuffle_2d_with_phase(x, phase, rad=rad), phase


def phase_shuffle_2d_ref(x, phase, rad=2):
    """Pure-JAX reference (reflect shift along axis 2)."""
    x_len = x.shape[2]
    t = jnp.arange(x_len, dtype=jnp.int32)
    src = jnp.abs(t - phase[0])
    src = jnp.where(src > x_len - 1, 2 * (x_len - 1) - src, src)
    return jnp.take(x, src, axis=2)


if __name__ == "__main__":
    key = jax.random.PRNGKey(0)
    k_data, k_phase, k_data2 = jax.random.split(key, 3)

    b, ch, x_len, y_ft = 2, 4, 16, 16
    rad = 2
    x = jax.random.normal(k_data, (b, ch, x_len, y_ft), dtype=jnp.float32)

    # 1) exercise every phase branch against the reference (pure copy => exact)
    for p in range(-rad, rad + 1):
        ph = jnp.array([p], dtype=jnp.int32)
        out = jax.block_until_ready(phase_shuffle_2d_with_phase(x, ph, rad=rad))
        ref = phase_shuffle_2d_ref(x, ph, rad=rad)
        assert out.shape == x.shape and out.dtype == x.dtype
        assert jnp.array_equal(out, ref), f"mismatch vs reference for phase={p}"

    # 2) ragged-grid path: n = b*ch = 9 not a multiple of the (forced-small) block
    x2 = jax.random.normal(k_data2, (3, 3, x_len, y_ft), dtype=jnp.float32)
    ph = jnp.array([-2], dtype=jnp.int32)
    out2 = jax.block_until_ready(
        phase_shuffle_2d_with_phase(x2, ph, rad=rad, block_bytes=4 << 10))
    assert jnp.array_equal(out2, phase_shuffle_2d_ref(x2, ph, rad=rad)), \
        "mismatch vs reference (ragged grid)"

    # 3) narrow dtype (bf16): exercises the 16-row sublane-tile alignment path
    xb = x.astype(jnp.bfloat16)
    ph = jnp.array([1], dtype=jnp.int32)
    outb = jax.block_until_ready(phase_shuffle_2d_with_phase(xb, ph, rad=rad))
    assert jnp.array_equal(outb, phase_shuffle_2d_ref(xb, ph, rad=rad)), \
        "mismatch vs reference (bf16)"

    # 4) module-equivalent call with a randomly sampled phase
    out, phase = phase_shuffle_2d(x, k_phase, rad=rad)
    out = jax.block_until_ready(out)
    assert jnp.array_equal(out, phase_shuffle_2d_ref(x, phase, rad=rad)), \
        "mismatch vs reference (random phase)"

    print("KERNEL_OK")
</pallas_src>

<mosaic_0001>
module attributes {stable_mosaic.version = 11 : i64} {
  func.func @kernel(%arg0: i32, %arg1: memref<1xi32, #tpu.memory_space<smem>>, %arg2: memref<8x256xf32, #tpu.memory_space<vmem>>, %arg3: memref<8x256xf32, #tpu.memory_space<vmem>>) attributes {dimension_semantics = [#tpu.dimension_semantics<parallel>], iteration_bounds = array<i64: 1>, scalar_prefetch = 1 : i64, scratch_operands = 0 : i64, tpu.core_type = #tpu.core_type<tc>, window_params = [{transform_indices = @transform_0, window_bounds = array<i64: 8, 256>}, {transform_indices = @transform_1, window_bounds = array<i64: 8, 256>}]} {
    %c0 = arith.constant 0 : index
    %0 = memref.load %arg1[%c0] : memref<1xi32, #tpu.memory_space<smem>>
    %c-2_i32 = arith.constant -2 : i32
    %1 = arith.cmpi eq, %0, %c-2_i32 : i32
    %2 = arith.extui %1 : i1 to i32
    %c0_i32 = arith.constant 0 : i32
    %3 = arith.cmpi ne, %2, %c0_i32 : i32
    scf.if %3 {
      %c0_5 = arith.constant 0 : index
      %c0_6 = arith.constant 0 : index
      %16 = vector.load %arg2[%c0_5, %c0_6] : memref<8x256xf32, #tpu.memory_space<vmem>>, vector<8x256xf32>
      %c224_i32 = arith.constant 224 : i32
      %17 = tpu.dynamic_rotate %16 by %c224_i32 dim 1 : vector<8x256xf32>, i32 -> vector<8x256xf32>
      %c0_7 = arith.constant 0 : index
      %c0_8 = arith.constant 0 : index
      %18 = vector.load %arg3[%c0_7, %c0_8] : memref<8x256xf32, #tpu.memory_space<vmem>>, vector<8x256xf32>
      tpu.vector_store %arg3[%c0_7, %c0_8], %17 {strides = array<i32>} : memref<8x256xf32, #tpu.memory_space<vmem>>, vector<8x256xf32>,
      %c0_9 = arith.constant 0 : index
      %c224 = arith.constant 224 : index
      %19 = vector.load %arg2[%c0_9, %c224] : memref<8x256xf32, #tpu.memory_space<vmem>>, vector<8x16xf32>
      %c0_10 = arith.constant 0 : index
      %c224_11 = arith.constant 224 : index
      %20 = vector.load %arg3[%c0_10, %c224_11] : memref<8x256xf32, #tpu.memory_space<vmem>>, vector<8x16xf32>
      tpu.vector_store %arg3[%c0_10, %c224_11], %19 {strides = array<i32>} : memref<8x256xf32, #tpu.memory_space<vmem>>, vector<8x16xf32>,
      %c0_12 = arith.constant 0 : index
      %c208 = arith.constant 208 : index
      %21 = vector.load %arg2[%c0_12, %c208] : memref<8x256xf32, #tpu.memory_space<vmem>>, vector<8x16xf32>
      %c0_13 = arith.constant 0 : index
      %c240 = arith.constant 240 : index
      %22 = vector.load %arg3[%c0_13, %c240] : memref<8x256xf32, #tpu.memory_space<vmem>>, vector<8x16xf32>
      tpu.vector_store %arg3[%c0_13, %c240], %21 {strides = array<i32>} : memref<8x256xf32, #tpu.memory_space<vmem>>, vector<8x16xf32>,
    } else {
    }
    %c-1_i32 = arith.constant -1 : i32
    %4 = arith.cmpi eq, %0, %c-1_i32 : i32
    %5 = arith.extui %4 : i1 to i32
    %c0_i32_0 = arith.constant 0 : i32
    %6 = arith.cmpi ne, %5, %c0_i32_0 : i32
    scf.if %6 {
      %c0_5 = arith.constant 0 : index
      %c0_6 = arith.constant 0 : index
      %16 = vector.load %arg2[%c0_5, %c0_6] : memref<8x256xf32, #tpu.memory_space<vmem>>, vector<8x256xf32>
      %c240_i32 = arith.constant 240 : i32
      %17 = tpu.dynamic_rotate %16 by %c240_i32 dim 1 : vector<8x256xf32>, i32 -> vector<8x256xf32>
      %c0_7 = arith.constant 0 : index
      %c0_8 = arith.constant 0 : index
      %18 = vector.load %arg3[%c0_7, %c0_8] : memref<8x256xf32, #tpu.memory_space<vmem>>, vector<8x256xf32>
      tpu.vector_store %arg3[%c0_7, %c0_8], %17 {strides = array<i32>} : memref<8x256xf32, #tpu.memory_space<vmem>>, vector<8x256xf32>,
      %c0_9 = arith.constant 0 : index
      %c224 = arith.constant 224 : index
      %19 = vector.load %arg2[%c0_9, %c224] : memref<8x256xf32, #tpu.memory_space<vmem>>, vector<8x16xf32>
      %c0_10 = arith.constant 0 : index
      %c240 = arith.constant 240 : index
      %20 = vector.load %arg3[%c0_10, %c240] : memref<8x256xf32, #tpu.memory_space<vmem>>, vector<8x16xf32>
      tpu.vector_store %arg3[%c0_10, %c240], %19 {strides = array<i32>} : memref<8x256xf32, #tpu.memory_space<vmem>>, vector<8x16xf32>,
    } else {
    }
    %c0_i32_1 = arith.constant 0 : i32
    %7 = arith.cmpi eq, %0, %c0_i32_1 : i32
    %8 = arith.extui %7 : i1 to i32
    %c0_i32_2 = arith.constant 0 : i32
    %9 = arith.cmpi ne, %8, %c0_i32_2 : i32
    scf.if %9 {
      %c0_5 = arith.constant 0 : index
      %c0_6 = arith.constant 0 : index
      %16 = vector.load %arg2[%c0_5, %c0_6] : memref<8x256xf32, #tpu.memory_space<vmem>>, vector<8x256xf32>
      %c0_7 = arith.constant 0 : index
      %c0_8 = arith.constant 0 : index
      %17 = vector.load %arg3[%c0_7, %c0_8] : memref<8x256xf32, #tpu.memory_space<vmem>>, vector<8x256xf32>
      tpu.vector_store %arg3[%c0_7, %c0_8], %16 {strides = array<i32>} : memref<8x256xf32, #tpu.memory_space<vmem>>, vector<8x256xf32>,
    } else {
    }
    %c1_i32 = arith.constant 1 : i32
    %10 = arith.cmpi eq, %0, %c1_i32 : i32
    %11 = arith.extui %10 : i1 to i32
    %c0_i32_3 = arith.constant 0 : i32
    %12 = arith.cmpi ne, %11, %c0_i32_3 : i32
    scf.if %12 {
      %c0_5 = arith.constant 0 : index
      %c0_6 = arith.constant 0 : index
      %16 = vector.load %arg2[%c0_5, %c0_6] : memref<8x256xf32, #tpu.memory_space<vmem>>, vector<8x256xf32>
      %c16_i32 = arith.constant 16 : i32
      %17 = tpu.dynamic_rotate %16 by %c16_i32 dim 1 : vector<8x256xf32>, i32 -> vector<8x256xf32>
      %c0_7 = arith.constant 0 : index
      %c0_8 = arith.constant 0 : index
      %18 = vector.load %arg3[%c0_7, %c0_8] : memref<8x256xf32, #tpu.memory_space<vmem>>, vector<8x256xf32>
      tpu.vector_store %arg3[%c0_7, %c0_8], %17 {strides = array<i32>} : memref<8x256xf32, #tpu.memory_space<vmem>>, vector<8x256xf32>,
      %c0_9 = arith.constant 0 : index
      %c16 = arith.constant 16 : index
      %19 = vector.load %arg2[%c0_9, %c16] : memref<8x256xf32, #tpu.memory_space<vmem>>, vector<8x16xf32>
      %c0_10 = arith.constant 0 : index
      %c0_11 = arith.constant 0 : index
      %20 = vector.load %arg3[%c0_10, %c0_11] : memref<8x256xf32, #tpu.memory_space<vmem>>, vector<8x16xf32>
      tpu.vector_store %arg3[%c0_10, %c0_11], %19 {strides = array<i32>} : memref<8x256xf32, #tpu.memory_space<vmem>>, vector<8x16xf32>,
    } else {
    }
    %c2_i32 = arith.constant 2 : i32
    %13 = arith.cmpi eq, %0, %c2_i32 : i32
    %14 = arith.extui %13 : i1 to i32
    %c0_i32_4 = arith.constant 0 : i32
    %15 = arith.cmpi ne, %14, %c0_i32_4 : i32
    scf.if %15 {
      %c0_5 = arith.constant 0 : index
      %c0_6 = arith.constant 0 : index
      %16 = vector.load %arg2[%c0_5, %c0_6] : memref<8x256xf32, #tpu.memory_space<vmem>>, vector<8x256xf32>
      %c32_i32 = arith.constant 32 : i32
      %17 = tpu.dynamic_rotate %16 by %c32_i32 dim 1 : vector<8x256xf32>, i32 -> vector<8x256xf32>
      %c0_7 = arith.constant 0 : index
      %c0_8 = arith.constant 0 : index
      %18 = vector.load %arg3[%c0_7, %c0_8] : memref<8x256xf32, #tpu.memory_space<vmem>>, vector<8x256xf32>
      tpu.vector_store %arg3[%c0_7, %c0_8], %17 {strides = array<i32>} : memref<8x256xf32, #tpu.memory_space<vmem>>, vector<8x256xf32>,
      %c0_9 = arith.constant 0 : index
      %c32 = arith.constant 32 : index
      %19 = vector.load %arg2[%c0_9, %c32] : memref<8x256xf32, #tpu.memory_space<vmem>>, vector<8x16xf32>
      %c0_10 = arith.constant 0 : index
      %c0_11 = arith.constant 0 : index
      %20 = vector.load %arg3[%c0_10, %c0_11] : memref<8x256xf32, #tpu.memory_space<vmem>>, vector<8x16xf32>
      tpu.vector_store %arg3[%c0_10, %c0_11], %19 {strides = array<i32>} : memref<8x256xf32, #tpu.memory_space<vmem>>, vector<8x16xf32>,
      %c0_12 = arith.constant 0 : index
      %c16 = arith.constant 16 : index
      %21 = vector.load %arg2[%c0_12, %c16] : memref<8x256xf32, #tpu.memory_space<vmem>>, vector<8x16xf32>
      %c0_13 = arith.constant 0 : index
      %c16_14 = arith.constant 16 : index
      %22 = vector.load %arg3[%c0_13, %c16_14] : memref<8x256xf32, #tpu.memory_space<vmem>>, vector<8x16xf32>
      tpu.vector_store %arg3[%c0_13, %c16_14], %21 {strides = array<i32>} : memref<8x256xf32, #tpu.memory_space<vmem>>, vector<8x16xf32>,
    } else {
    }
    return
  }
  func.func @transform_0(%arg0: i32, %arg1: memref<1xi32, #tpu.memory_space<smem>>) -> (i32, i32) {
    %c0_i32 = arith.constant 0 : i32
    %c0_i32_0 = arith.constant 0 : i32
    return %arg0, %c0_i32 : i32, i32
  }
  func.func @transform_1(%arg0: i32, %arg1: memref<1xi32, #tpu.memory_space<smem>>) -> (i32, i32) {
    %c0_i32 = arith.constant 0 : i32
    %c0_i32_0 = arith.constant 0 : i32
    return %arg0, %c0_i32 : i32, i32
  }
}

</mosaic_0001>

<bundles_post_ra>
// kernel: tpu_custom_call.1
= control target key start
LH: loop header
LB: loop body
LE: loop exit
PB: predicated region body
PF: predicated region fallthrough
CT: control target
= control target key end

     0   :  { %8 = vsyncpa [#allocation5], 0  ;;  %s266_s0 = inlined_call_operand.<no memory space> [shape: s32[1], index: 0, kind: input, shape index: {}]   ;;  %s267_s1 = inlined_call_operand.hbm [shape: f32[8,256], index: 1, kind: input, shape index: {}]   ;;  %s268_s2 = inlined_call_operand.hbm [shape: f32[8,256], index: 2, kind: output, shape index: {}]  }
   0x1   :  { %9 = vsyncpa [#allocation6], 0  ;;  %s15_s11 = sshll.u32 %s267_s1, 4  ;;  %s220_s12 = smov [#allocation4]   ;;  %s16_s11 = int_to_ptr.hbm [resolvable:$true] %s15_s11 }
   0x2   :  { %s17_s13 = sshll.u32 %s220_s12, 4  ;;  %s18_s13 = int_to_ptr.vmem [resolvable:$true] %s17_s13 }
   0x3   :  { %20 = dma.hbm_to_vmem [thread:$0]  %s16_s11, 256, %s18_s13, [#allocation5]  }
   0x4   :  { %216 = dma.done.wait [#allocation5], 256  }
   0x5   :  { %217 = vsyncadd [#allocation5], 4294967040  ;;  %p153_p0 = scmp.ne.s32.totalorder %s266_s0, 4294967294 }
   0x6   :  { %s221_s16 = smov (!%p153_p0), 96   ;;  %s222_s17 = smov (!%p153_p0), 32  }
   0x7   :  { %29 = sbr.rel (%p153_p0) target bundleno = 141 (0x8d), region = 13 }
   0xc   :  { %v30_v0 = vld [vmem:[#allocation4] sm:$0xff]  ;;  %v31_v1 = vld [vmem:[#allocation4 + $0x8] sm:$0xff]  ;;  %v36_v2 = vlaneseq  ;;  %vm44_vm1 = vcmask 917248   ;;  %vm51_vm2 = vcmask 1048448  }
   0xd   :  { %32 = vrot.lane.b32.xlu0 %v30_v0, %s221_s16  ;;  %48 = vrot.lane.b32.xlu1 %v31_v1, %s222_s17 }
   0xe   :  { %v37_v4 = vand.u32 127, %v36_v2 }
  0x10   :  { %vm38_vm0 = vcmp.lt.s32.totalorder %v37_v4, 96 }
  0x15   :  { %34 = vrot.lane.b32.xlu0 %v31_v1, %s221_s16 }
  0x7f   :  { %v33_v3 = vpop.permute.xlu0 %32  ;;  %v49_v8 = vpop.permute.xlu1 %48 }
  0x87   :  { %v35_v5 = vpop.permute.xlu0 %34 }
  0x88   :  { %v39_v6 = vsel %vm38_vm0, %v33_v3, %v35_v5  ;;  %v40_v7 = vsel %vm38_vm0, %v35_v5, %v33_v3 }
  0x89   :  { %41 = vst [vmem:[#allocation7] sm:$0xff] %v39_v6 }
  0x8a   :  { %42 = vst [vmem:[#allocation7 + $0x8] sm:$0xff] %v40_v7 }
  0x8b   :  { %45 = vst.msk [vmem:[#allocation7 + $0x8] sm:$0xff] %vm44_vm1, %v31_v1 }
  0x8c   :  { %52 = vst.msk [vmem:[#allocation7 + $0x8] sm:$0xff] %vm51_vm2, %v49_v8 }
  0x8d PF:  { %p154_p1 = scmp.ne.s32.totalorder %s266_s0, 4294967295 }
  0x8e   :  { %s223_s19 = smov (!%p154_p1), 112   ;;  %s224_s20 = smov (!%p154_p1), 16  }
  0x8f   :  { %56 = sbr.rel (%p154_p1) target bundleno = 276 (0x114), region = 17 }
  0x94   :  { %v57_v9 = vld [vmem:[#allocation4] sm:$0xff]  ;;  %v58_v10 = vld [vmem:[#allocation4 + $0x8] sm:$0xff]  ;;  %v63_v11 = vlaneseq  ;;  %vm75_vm4 = vcmask 1048448  }
  0x95   :  { %59 = vrot.lane.b32.xlu0 %v57_v9, %s223_s19  ;;  %72 = vrot.lane.b32.xlu1 %v58_v10, %s224_s20 }
  0x96   :  { %v64_v13 = vand.u32 127, %v63_v11 }
  0x98   :  { %vm65_vm3 = vcmp.lt.s32.totalorder %v64_v13, 112 }
  0x9d   :  { %61 = vrot.lane.b32.xlu0 %v58_v10, %s223_s19 }
 0x107   :  { %v60_v12 = vpop.permute.xlu0 %59  ;;  %v73_v17 = vpop.permute.xlu1 %72 }
 0x10f   :  { %v62_v14 = vpop.permute.xlu0 %61 }
 0x110   :  { %v66_v15 = vsel %vm65_vm3, %v60_v12, %v62_v14  ;;  %v67_v16 = vsel %vm65_vm3, %v62_v14, %v60_v12 }
 0x111   :  { %68 = vst [vmem:[#allocation7] sm:$0xff] %v66_v15 }
 0x112   :  { %69 = vst [vmem:[#allocation7 + $0x8] sm:$0xff] %v67_v16 }
 0x113   :  { %76 = vst.msk [vmem:[#allocation7 + $0x8] sm:$0xff] %vm75_vm4, %v73_v17 }
 0x114 PF:  { %p155_p2 = scmp.ne.s32.totalorder %s266_s0, 0 }
 0x116   :  { %80 = sbr.rel (%p155_p2) target bundleno = 286 (0x11e), region = 21 }
 0x11b   :  { %v81_v18 = vld [vmem:[#allocation4] sm:$0xff]  ;;  %v82_v19 = vld [vmem:[#allocation4 + $0x8] sm:$0xff] }
 0x11c   :  { %83 = vst [vmem:[#allocation7] sm:$0xff] %v81_v18 }
 0x11d   :  { %84 = vst [vmem:[#allocation7 + $0x8] sm:$0xff] %v82_v19 }
 0x11e PF:  { %p156_p3 = scmp.ne.s32.totalorder %s266_s0, 1 }
 0x11f   :  { %s225_s25 = smov (!%p156_p3), 16   ;;  %s226_s26 = smov (!%p156_p3), 112  }
 0x120   :  { %88 = sbr.rel (%p156_p3) target bundleno = 421 (0x1a5), region = 25 }
 0x125   :  { %v89_v20 = vld [vmem:[#allocation4] sm:$0xff]  ;;  %v90_v21 = vld [vmem:[#allocation4 + $0x8] sm:$0xff]  ;;  %v95_v22 = vlaneseq  ;;  %vm107_vm6 = vcmask 130048  }
 0x126   :  { %91 = vrot.lane.b32.xlu0 %v89_v20, %s225_s25  ;;  %104 = vrot.lane.b32.xlu1 %v89_v20, %s226_s26 }
 0x127   :  { %v96_v24 = vand.u32 127, %v95_v22 }
 0x129   :  { %vm97_vm5 = vcmp.lt.s32.totalorder %v96_v24, 16 }
 0x12e   :  { %93 = vrot.lane.b32.xlu0 %v90_v21, %s225_s25 }
 0x198   :  { %v92_v23 = vpop.permute.xlu0 %91  ;;  %v105_v28 = vpop.permute.xlu1 %104 }
 0x1a0   :  { %v94_v25 = vpop.permute.xlu0 %93 }
 0x1a1   :  { %v98_v26 = vsel %vm97_vm5, %v92_v23, %v94_v25  ;;  %v99_v27 = vsel %vm97_vm5, %v94_v25, %v92_v23 }
 0x1a2   :  { %100 = vst [vmem:[#allocation7] sm:$0xff] %v99_v27 }
 0x1a3   :  { %101 = vst [vmem:[#allocation7 + $0x8] sm:$0xff] %v98_v26 }
 0x1a4   :  { %108 = vst.msk [vmem:[#allocation7] sm:$0xff] %vm107_vm6, %v105_v28 }
 0x1a5 PF:  { %p157_p4 = scmp.ne.s32.totalorder %s266_s0, 2 }
 0x1a6   :  { %s227_s29 = smov (!%p157_p4), 32   ;;  %s228_s30 = smov (!%p157_p4), 96  }
 0x1a7   :  { %112 = sbr.rel (%p157_p4) target bundleno = 557 (0x22d), region = 29 }
 0x1ac   :  { %v113_v29 = vld [vmem:[#allocation4] sm:$0xff]  ;;  %v114_v30 = vld [vmem:[#allocation4 + $0x8] sm:$0xff]  ;;  %v119_v31 = vlaneseq  ;;  %vm131_vm8 = vcmask 130048   ;;  %vm134_vm9 = vcmask 261248  }
 0x1ad   :  { %115 = vrot.lane.b32.xlu0 %v113_v29, %s227_s29  ;;  %128 = vrot.lane.b32.xlu1 %v113_v29, %s228_s30 }
 0x1ae   :  { %v120_v33 = vand.u32 127, %v119_v31 }
 0x1b0   :  { %vm121_vm7 = vcmp.lt.s32.totalorder %v120_v33, 32 }
 0x1b5   :  { %117 = vrot.lane.b32.xlu0 %v114_v30, %s227_s29 }
 0x21f   :  { %v116_v32 = vpop.permute.xlu0 %115  ;;  %v129_v37 = vpop.permute.xlu1 %128 }
 0x227   :  { %v118_v34 = vpop.permute.xlu0 %117 }
 0x228   :  { %v122_v35 = vsel %vm121_vm7, %v116_v32, %v118_v34  ;;  %v123_v36 = vsel %vm121_vm7, %v118_v34, %v116_v32 }
 0x229   :  { %124 = vst [vmem:[#allocation7] sm:$0xff] %v123_v36 }
 0x22a   :  { %125 = vst [vmem:[#allocation7 + $0x8] sm:$0xff] %v122_v35 }
 0x22b   :  { %132 = vst.msk [vmem:[#allocation7] sm:$0xff] %vm131_vm8, %v129_v37 }
 0x22c   :  { %135 = vst.msk [vmem:[#allocation7] sm:$0xff] %vm134_vm9, %v113_v29 }
 0x22d PF:  { %s143_s4 = sshll.u32 %s268_s2, 4  ;;  %s229_s5 = smov [#allocation7]   ;;  %s144_s4 = int_to_ptr.hbm [resolvable:$true] %s143_s4 }
 0x22e   :  { %s141_s6 = sshll.u32 %s229_s5, 4  ;;  %s142_s6 = int_to_ptr.vmem [resolvable:$true] %s141_s6 }
 0x22f   :  { %146 = dma.vmem_to_hbm [thread:$0]  %s142_s6, 256, %s144_s4, [#allocation6]  }
 0x230   :  { %218 = dma.done.wait [#allocation6], 256  }
 0x231   :  { %219 = vsyncadd [#allocation6], 4294967040 }
 0x232   :  { %151 = vsyncpa [#allocation5], 1 }
 0x233   :  { %152 = vsyncpa [#allocation6], 1 }

</bundles_post_ra>
